<compile_context>
chip_gen: v7x
topology: tpu7x:2x2x1
jax: 0.10.0
libtpu: 0.0.40
codegen_flags: <defaults>
</compile_context>

<pallas_src>
import jax
import jax.numpy as jnp
from jax.experimental import pallas as pl
from jax.experimental.pallas import tpu as pltpu

EMBEDDING_SIZE = 32  # stand-in for const.EMBEDDING_SIZE


def _round_up(x: int, m: int) -> int:
    return ((x + m - 1) // m) * m


def _embedding_gather_kernel(ids_ref, table_ref, out_ref):
    # ids_ref:   VMEM (TILE_N, 1) int32  -- token ids for this tile
    # table_ref: VMEM (V, E)             -- full embedding table, resident across grid
    # out_ref:   VMEM (TILE_N, E)        -- gathered embeddings for this tile
    tile_n = ids_ref.shape[0]
    vocab = table_ref.shape[0]

    # Clamp out-of-range ids (PyTorch would raise; we stay in-bounds deterministically).
    ids = jnp.clip(ids_ref[...], 0, vocab - 1)                      # (TILE_N, 1) int32

    # One-hot gather on the MXU: onehot[t, v] = (ids[t] == v).
    vocab_iota = jax.lax.broadcasted_iota(jnp.int32, (tile_n, vocab), 1)
    onehot = (ids == vocab_iota).astype(table_ref.dtype)            # (TILE_N, V)

    gathered = jnp.dot(onehot, table_ref[...],
                       preferred_element_type=jnp.float32)          # (TILE_N, E) f32
    out_ref[...] = gathered.astype(out_ref.dtype)


def embedding_lookup(table: jax.Array, token_ids: jax.Array, *, tile_n: int = 512) -> jax.Array:
    """Equivalent of nn.Embedding(table)(token_ids) for token_ids of shape (B, S)."""
    B, S = token_ids.shape
    V, E = table.shape
    N = B * S

    # Flatten ids to a (N, 1) int32 column so they tile as clean VMEM blocks.
    flat_ids = token_ids.reshape(N, 1).astype(jnp.int32)

    # Tile size: multiple of 8 (sublane granularity); shrink for tiny inputs.
    tile_n = max(8, min(tile_n, _round_up(N, 8)))
    n_pad = _round_up(N, tile_n)
    if n_pad != N:
        flat_ids = jnp.pad(flat_ids, ((0, n_pad - N), (0, 0)))       # pad with valid id 0

    num_tiles = n_pad // tile_n

    out = pl.pallas_call(
        _embedding_gather_kernel,
        out_shape=jax.ShapeDtypeStruct((n_pad, E), table.dtype),
        grid_spec=pltpu.PrefetchScalarGridSpec(
            num_scalar_prefetch=0,
            grid=(num_tiles,),
            in_specs=[
                # Token-id tile for this grid step.
                pl.BlockSpec((tile_n, 1), lambda i: (i, 0)),
                # Full table, constant index_map -> fetched once, resident in VMEM.
                pl.BlockSpec((V, E), lambda i: (0, 0)),
            ],
            out_specs=pl.BlockSpec((tile_n, E), lambda i: (i, 0)),
        ),
        compiler_params=pltpu.CompilerParams(
            # Token tiles are fully independent -> shardable across TCs (v7x megacore).
            dimension_semantics=("parallel",),
            # Resident-table path: raise scoped VMEM above v5e's 16 MiB default,
            # while staying within v7x's 64 MiB physical VMEM.
            vmem_limit_bytes=64 * 1024 * 1024,
        ),
    )(flat_ids, table)

    return out[:N].reshape(B, S, E)


if __name__ == "__main__":
    key = jax.random.PRNGKey(0)
    k_w, k_idx, k_idx2 = jax.random.split(key, 3)

    # Synthetic deterministic "token_weights" (vocab_size x emb_size), as in __init__.
    vocab_size = 64
    emb_size = EMBEDDING_SIZE
    token_weights = jax.random.normal(k_w, (vocab_size, emb_size), dtype=jnp.float32)

    # Small token-id batch: batch=2, seq=8 (single tile).
    batch, seq = 2, 8
    token_ids = jax.random.randint(k_idx, (batch, seq), 0, vocab_size, dtype=jnp.int32)

    out = embedding_lookup(token_weights, token_ids)
    out = jax.block_until_ready(out)

    ref = jnp.take(token_weights, token_ids, axis=0)
    assert out.shape == (batch, seq, emb_size)
    assert out.dtype == jnp.float32
    assert bool(jnp.allclose(out, ref)), "Pallas embedding lookup mismatch (single tile)"

    # Second check: multiple grid tiles + padding path (N=150, tile_n=64 -> 3 tiles).
    batch2, seq2 = 3, 50
    token_ids2 = jax.random.randint(k_idx2, (batch2, seq2), 0, vocab_size, dtype=jnp.int32)
    out2 = embedding_lookup(token_weights, token_ids2, tile_n=64)
    out2 = jax.block_until_ready(out2)
    ref2 = jnp.take(token_weights, token_ids2, axis=0)
    assert out2.shape == (batch2, seq2, emb_size)
    assert bool(jnp.allclose(out2, ref2)), "Pallas embedding lookup mismatch (multi tile)"

    # NOTE: EmbeddingLayer.forward() is literally `pass` in the PyTorch source;
    # the meaningful computation (get_embedding) is what is implemented here.
    print("KERNEL_OK")
</pallas_src>

<mosaic_0001>
module attributes {stable_mosaic.version = 11 : i64} {
  func.func @_embedding_gather_kernel(%arg0: i32, %arg1: memref<16x1xi32, #tpu.memory_space<vmem>>, %arg2: memref<64x32xf32, #tpu.memory_space<vmem>>, %arg3: memref<16x32xf32, #tpu.memory_space<vmem>>) attributes {dimension_semantics = [#tpu.dimension_semantics<parallel>], iteration_bounds = array<i64: 1>, scalar_prefetch = 0 : i64, scratch_operands = 0 : i64, tpu.core_type = #tpu.core_type<tc>, window_params = [{transform_indices = @transform_0, window_bounds = array<i64: 16, 1>}, {pipeline_mode = #tpu.pipeline_mode<synchronous>, transform_indices = @transform_1, window_bounds = array<i64: 64, 32>}, {transform_indices = @transform_2, window_bounds = array<i64: 16, 32>}]} {
    %c0 = arith.constant 0 : index
    %c0_0 = arith.constant 0 : index
    %0 = vector.load %arg1[%c0, %c0_0] : memref<16x1xi32, #tpu.memory_space<vmem>>, vector<16x1xi32>
    %c0_i32 = arith.constant 0 : i32
    %c63_i32 = arith.constant 63 : i32
    %1 = vector.broadcast %c0_i32 : i32 to vector<16x1xi32>
    %2 = arith.maxsi %1, %0 : vector<16x1xi32>
    %3 = vector.broadcast %c63_i32 : i32 to vector<16x1xi32>
    %4 = arith.minsi %3, %2 : vector<16x1xi32>
    %5 = tpu.iota {dimensions = array<i32: 1>} : vector<16x64xi32>
    %6 = vector.broadcast %4 : vector<16x1xi32> to vector<16x64xi32>
    %7 = arith.cmpi eq, %6, %5 : vector<16x64xi32>
    %8 = arith.extui %7 : vector<16x64xi1> to vector<16x64xi32>
    %9 = arith.sitofp %8 : vector<16x64xi32> to vector<16x64xf32>
    %c0_1 = arith.constant 0 : index
    %c0_2 = arith.constant 0 : index
    %10 = vector.load %arg2[%c0_1, %c0_2] : memref<64x32xf32, #tpu.memory_space<vmem>>, vector<64x32xf32>
    %cst = arith.constant dense<0.000000e+00> : vector<16x32xf32>
    %11 = tpu.matmul %9, %10, %cst {dimension_numbers = #tpu.dot_dimension_numbers<[1], [0], [0], [1], [0, 0, 1, 1], [], []>} : vector<16x64xf32>, vector<64x32xf32>, vector<16x32xf32> -> vector<16x32xf32>
    %c0_3 = arith.constant 0 : index
    %c0_4 = arith.constant 0 : index
    %12 = vector.load %arg3[%c0_3, %c0_4] : memref<16x32xf32, #tpu.memory_space<vmem>>, vector<16x32xf32>
    tpu.vector_store %arg3[%c0_3, %c0_4], %11 {strides = array<i32>} : memref<16x32xf32, #tpu.memory_space<vmem>>, vector<16x32xf32>,
    return
  }
  func.func @transform_0(%arg0: i32) -> (i32, i32) {
    %c0_i32 = arith.constant 0 : i32
    %c0_i32_0 = arith.constant 0 : i32
    return %arg0, %c0_i32 : i32, i32
  }
  func.func @transform_1(%arg0: i32) -> (i32, i32) {
    %c0_i32 = arith.constant 0 : i32
    %c0_i32_0 = arith.constant 0 : i32
    %c0_i32_1 = arith.constant 0 : i32
    return %c0_i32, %c0_i32_0 : i32, i32
  }
  func.func @transform_2(%arg0: i32) -> (i32, i32) {
    %c0_i32 = arith.constant 0 : i32
    %c0_i32_0 = arith.constant 0 : i32
    return %arg0, %c0_i32 : i32, i32
  }
}

</mosaic_0001>

<bundles_post_ra>
// kernel: tpu_custom_call.1
= control target key start
LH: loop header
LB: loop body
LE: loop exit
PB: predicated region body
PF: predicated region fallthrough
CT: control target
= control target key end

     0   :  { %7 = vsyncpa [#allocation3], 0  ;;  %s371_s0 = inlined_call_operand.hbm [shape: s32[16,1], index: 0, kind: input, shape index: {}]   ;;  %s372_s1 = inlined_call_operand.hbm [shape: f32[64,32], index: 1, kind: input, shape index: {}]   ;;  %s373_s2 = inlined_call_operand.hbm [shape: f32[16,32], index: 2, kind: output, shape index: {}]  }
   0x1   :  { %8 = vsyncpa [#allocation6], 0 }
   0x2   :  { %9 = vsyncpa [#allocation4], 0  ;;  %s304_s9 = smov [#allocation2]   ;;  %s232_s13 = scalar_lea.hbm %s371_s0, 256 }
   0x3   :  { %s15_s10 = sshll.u32 %s304_s9, 4  ;;  %p233_p0 = scmp.ne.s32.totalorder %s371_s0, %s232_s13  ;;  %s16_s10 = int_to_ptr.vmem [resolvable:$true] %s15_s10 }
   0x4   :  { %p236_p1 = scmp.lt.u32.totalorder %s232_s13, %s371_s0 }
   0x6   :  { %p238_p2 = pnand %p236_p1, %p233_p0 }
   0x8   :  { %241 = shalt.err (!%p238_p2)
}
   0x9   :  { %s242_s18 = scalar_lea.vmem %s16_s10, 256  ;;  %p247_p4 = scmp.lt.s32.totalorder %s16_s10, %s16_s10 }
   0xa   :  { %p243_p3 = scmp.ne.s32.totalorder %s16_s10, %s242_s18  ;;  %p248_p5 = scmp.lt.s32.totalorder %s242_s18, %s242_s18 }
   0xc   :  { %p249_p6 = por %p248_p5, %p247_p4 }
   0xe   :  { %p250_p7 = pnand %p249_p6, %p243_p3 }
  0x10   :  { %253 = shalt.err (!%p250_p7)
}
  0x11   :  { %s305_s19 = smov 128   ;;  %s306_s20 = smov 8  }
  0x12   :  { %21 = dma.hbm_to_vmem [thread:$0]  %s371_s0, 256, %s16_s10, [#allocation3], %s305_s19, %s305_s19, %s306_s20  }
  0x13   :  { %s307_s23 = smov [#allocation5]   ;;  %s254_s27 = scalar_lea.hbm %s372_s1, 1024 }
  0x14   :  { %s27_s24 = sshll.u32 %s307_s23, 4  ;;  %p255_p8 = scmp.ne.s32.totalorder %s372_s1, %s254_s27  ;;  %s28_s24 = int_to_ptr.vmem [resolvable:$true] %s27_s24 }
  0x15   :  { %p258_p9 = scmp.lt.u32.totalorder %s254_s27, %s372_s1 }
  0x17   :  { %p260_p10 = pnand %p258_p9, %p255_p8 }
  0x19   :  { %263 = shalt.err (!%p260_p10)
}
  0x1a   :  { %s264_s4 = scalar_lea.vmem %s28_s24, 1024  ;;  %p269_p12 = scmp.lt.s32.totalorder %s28_s24, %s28_s24 }
  0x1b   :  { %p265_p11 = scmp.ne.s32.totalorder %s28_s24, %s264_s4  ;;  %p270_p13 = scmp.lt.s32.totalorder %s264_s4, %s264_s4 }
  0x1d   :  { %p271_p0 = por %p270_p13, %p269_p12 }
  0x1f   :  { %p272_p1 = pnand %p271_p0, %p265_p11 }
  0x21   :  { %275 = shalt.err (!%p272_p1)
}
  0x22   :  { %33 = dma.hbm_to_vmem [thread:$0]  %s372_s1, 1024, %s28_s24, [#allocation6], %s305_s19, %s305_s19, %s306_s20  }
  0x23   :  { %298 = dma.done.wait [#allocation3], 256  }
  0x24   :  { %299 = vsyncadd [#allocation3], 4294967040 }
  0x25   :  { %300 = dma.done.wait [#allocation6], 1024  }
  0x26   :  { %301 = vsyncadd [#allocation6], 4294966272  ;;  %v308_v0 = vmov 0   ;;  %v40_v1 = vld [vmem:[#allocation2] sm:$0xff]  ;;  %v41_v2 = vld [vmem:[#allocation2 + $0x8] sm:$0xff]  ;;  %v50_v19 = vlaneseq  ;;  %vm72_vm4 = vcmask 523264  }
  0x27   :  { %231 = vset.pattern.permute.xlu0 %v308_v0  ;;  %v64_v3 = vld [vmem:[#allocation5] sm:$0xff]  ;;  %vm42_vm0 = vcmp.gt.s32.totalorder %v40_v1, 0  ;;  %vm44_vm1 = vcmp.gt.s32.totalorder %v41_v2, 0  ;;  %v65_v4 = vld [vmem:[#allocation5 + $0x8] sm:$0xff]  ;;  %v66_v5 = vld [vmem:[#allocation5 + $0x10] sm:$0xff]  ;;  %v309_v22 = vmov 0.0  }
  0x28   :  { %v67_v6 = vld [vmem:[#allocation5 + $0x18] sm:$0xff]  ;;  %v43_v7 = vsel %vm42_vm0, %v40_v1, 0  ;;  %v45_v8 = vsel %vm44_vm1, %v41_v2, 0  ;;  %v208_v9 = vpack.c.bf16 %v65_v4, %v64_v3  ;;  %v68_v11 = vld [vmem:[#allocation5 + $0x20] sm:$0xff]  ;;  %v69_v12 = vld [vmem:[#allocation5 + $0x28] sm:$0xff]  ;;  %v51_v20 = vand.u32 127, %v50_v19 }
  0x29   :  { %v212_v10 = vpack.c.bf16 %v67_v6, %v66_v5  ;;  %vm46_vm2 = vcmp.lt.s32.totalorder %v43_v7, 63  ;;  %vm48_vm3 = vcmp.lt.s32.totalorder %v45_v8, 63  ;;  %v216_v15 = vpack.c.bf16 %v69_v12, %v68_v11  ;;  %v70_v16 = vld [vmem:[#allocation5 + $0x30] sm:$0xff]  ;;  %v71_v17 = vld [vmem:[#allocation5 + $0x38] sm:$0xff]  ;;  %s310_s1 = smov [#allocation7]  }
  0x2a   :  { %v47_v13 = vsel %vm46_vm2, %v43_v7, 63  ;;  %209 = vmatprep.subr.bf16.mxu0 %v208_v9  ;;  %v49_v14 = vsel %vm48_vm3, %v45_v8, 63  ;;  %v220_v18 = vpack.c.bf16 %v71_v17, %v70_v16  ;;  %s162_s6 = sshll.u32 %s310_s1, 4  ;;  %vm154_vm7 = vcmask 261120   ;;  %s163_s6 = int_to_ptr.vmem [resolvable:$true] %s162_s6 }
  0x2b   :  { %53 = vperm.xlu0 %231, %v47_v13   ;;  %211 = vmatpush3.bf16.msra.mxu0 %v208_v9  ;;  %s276_s7 = scalar_lea.vmem %s163_s6, 256  ;;  %p281_p3 = scmp.lt.s32.totalorder %s163_s6, %s163_s6 }
  0x2c   :  { %213 = vmatprep.subr.bf16.mxu0 %v212_v10  ;;  %p277_p2 = scmp.ne.s32.totalorder %s163_s6, %s276_s7  ;;  %p282_p4 = scmp.lt.s32.totalorder %s276_s7, %s276_s7 }
  0x2e   :  { %p283_p5 = por %p282_p4, %p281_p3 }
  0x2f   :  { %56 = vperm.xlu0 %231, %v49_v14   ;;  %215 = vmatpush3.bf16.msra.mxu0 %v212_v10 }
  0x30   :  { %217 = vmatprep.subr.bf16.mxu0 %v216_v15  ;;  %p284_p6 = pnand %p283_p5, %p277_p2 }
  0x33   :  { %219 = vmatpush3.bf16.msra.mxu0 %v216_v15 }
  0x34   :  { %221 = vmatprep.subr.bf16.mxu0 %v220_v18 }
  0x37   :  { %223 = vmatpush3.bf16.msra.mxu0 %v220_v18 }
  0xaa   :  { %v54_v21 = vpop.permute.xlu0 %53 }
  0xab   :  { %vm58_vm5 = vcmp.eq.s32.totalorder %v54_v21, %v51_v20 }
  0xac   :  { %v175_v23 = vsel %vm58_vm5, 1.0, %v309_v22 }
  0xad   :  { %205 = vmatprep.mubr.msk.f32.mxu0 %vm72_vm4, %v175_v23 }
  0xae   :  { %v57_v24 = vpop.permute.xlu0 %56 }
  0xaf   :  { %vm59_vm6 = vcmp.eq.s32.totalorder %v57_v24, %v51_v20 }
  0xb0   :  { %v176_v25 = vsel %vm59_vm6, 1.0, %v309_v22 }
  0xb1   :  { %206 = vmatmul.mubr.msk.f32.vlgmr.msra.gmra.mrb[0].mxu0 %vm72_vm4, %v176_v25 }
 0x184   :  { %v207_v26 = vpop.f32.mrb[0].mxu0 }
 0x185   :  { %156 = vst.msk [vmem:[#allocation7 + $0x8] sm:$0xff] %vm154_vm7, %v207_v26  ;;  %v145_v27 = vpop.f32.mrb[1].mxu0 }
 0x186   :  { %155 = vst.msk [vmem:[#allocation7] sm:$0xff] %vm154_vm7, %v145_v27 }
 0x187   :  { %287 = shalt.err (!%p284_p6)
}
 0x188   :  { %s288_s10 = scalar_lea.hbm %s373_s2, 256 }
 0x189   :  { %p289_p7 = scmp.ne.s32.totalorder %s373_s2, %s288_s10  ;;  %p292_p8 = scmp.lt.u32.totalorder %s288_s10, %s373_s2 }
 0x18b   :  { %p294_p9 = pnand %p292_p8, %p289_p7 }
 0x18d   :  { %297 = shalt.err (!%p294_p9)
}
 0x18e   :  { %168 = dma.vmem_to_hbm [thread:$0]  %s163_s6, 256, %s373_s2, [#allocation4], %s305_s19, %s305_s19, %s306_s20  }
 0x18f   :  { %302 = dma.done.wait [#allocation4], 256  }
 0x190   :  { %303 = vsyncadd [#allocation4], 4294967040 }
 0x191   :  { %172 = vsyncpa [#allocation3], 1 }
 0x192   :  { %173 = vsyncpa [#allocation6], 1 }
 0x193   :  { %174 = vsyncpa [#allocation4], 1 }

</bundles_post_ra>
